<compile_context>
chip_gen: v7x
topology: tpu7x:2x2x1
jax: 0.10.0
libtpu: 0.0.40
codegen_flags: <defaults>
</compile_context>

<pallas_src>
import functools

import jax
import jax.numpy as jnp
from jax import lax
from jax.experimental import pallas as pl
from jax.experimental.pallas import tpu as pltpu


def _calc_dilations(cycle_length):
    rates, d = [], 1
    while d < cycle_length:
        rates.append(d)
        d *= 2
    return rates


def _ddc_kernel(x_ref, w_ref, gb_ref, out_ref, *, layer_cfgs, eps):
    """layer_cfgs: tuple of (c_in, c_out, dilation, weight_row_offset, channel_offset)."""
    h = x_ref[...]                                   # (B, C0, L) f32, channels on sublanes
    B, L = h.shape[0], h.shape[2]
    inv_cnt = 1.0 / float(B * L)

    # Hoisted once for all layers: lane index, broadcast by jnp.where per layer.
    lane = lax.broadcasted_iota(jnp.int32, (1, 1, L), 2)

    for (c_in, c_out, d, r0, ch0) in layer_cfgs:
        # ---- dilated taps: two circular rolls on the whole (B, c_in, L) stack, with
        #      zero padding realised via the hoisted lane masks (valid for 0 < d < L) ----
        tap_m = jnp.where(lane >= d, pltpu.roll(h, shift=d, axis=2), 0.0)          # x[l-d]
        tap_p = jnp.where(lane < L - d, pltpu.roll(h, shift=L - d, axis=2), 0.0)   # x[l+d]

        # ---- Conv1d(k=3, dilation=d, padding=d); conv bias dropped (cancels in BN) ----
        # Accumulate all 3 taps in the VALU, then ONE sublane (XLU) reduce per out chan.
        cols = []
        for o in range(c_out):
            r = r0 + 3 * o
            s = (tap_m * w_ref[r + 0, :c_in, :]
                 + h * w_ref[r + 1, :c_in, :]
                 + tap_p * w_ref[r + 2, :c_in, :])             # (B, c_in, L)
            cols.append(jnp.sum(s, axis=1, keepdims=True))     # (B, 1, L)
        ys = cols[0] if c_out == 1 else jnp.concatenate(cols, axis=1)   # (B, c_out, L)

        # ---- BatchNorm1d (training-mode batch stats) folded into scale/shift ----
        s1 = jnp.sum(jnp.sum(ys, axis=2, keepdims=True), axis=0, keepdims=True)
        s2 = jnp.sum(jnp.sum(ys * ys, axis=2, keepdims=True), axis=0, keepdims=True)
        mean = s1 * inv_cnt                                    # (1, c_out, 1)
        var = jnp.maximum(s2 * inv_cnt - mean * mean, 0.0)     # clamp -> no NaN in rsqrt
        gamma = gb_ref[0, ch0:ch0 + c_out, :]                  # (c_out, 1)
        beta = gb_ref[1, ch0:ch0 + c_out, :]
        scale = gamma * lax.rsqrt(var + eps)                   # (1, c_out, 1), EUP rsqrt
        shift = beta - mean * scale
        y = jnp.maximum(ys * scale + shift, 0.0)               # BN affine + ReLU

        # torch.cat(outputs, dim=1): stream this layer's slice out now (lane-dense store).
        out_ref[:, ch0:ch0 + c_out, :] = y
        h = y                                                  # chained into next layer


def dynamic_dilated_conv_cat(x, params_per_layer, dilations, eps=1e-5):
    """x: (B, C_in, L) float32. params_per_layer: list of (w, bias, gamma, beta).

    The conv bias is intentionally ignored: train-mode BatchNorm subtracts the batch mean
    immediately after the conv, so the bias cancels exactly in the forward output.
    """
    B, C, L = x.shape

    layer_cfgs, w_rows, gammas, betas = [], [], [], []
    prev, row_off, ch_off, c_max = C, 0, 0, C
    for (w, _b, g, be), d in zip(params_per_layer, dilations):
        c_out, c_in, k = w.shape
        assert k == 3 and c_in == prev
        assert 0 < d < L, "roll-based zero padding assumes dilation < L"
        c_max = max(c_max, c_in)
        # row (o*3 + k) holds w[o, :, k] along sublanes.
        wl = jnp.transpose(w, (0, 2, 1)).reshape(c_out * 3, c_in).astype(jnp.float32)
        w_rows.append((wl, int(c_in)))
        gammas.append(g.astype(jnp.float32))
        betas.append(be.astype(jnp.float32))
        layer_cfgs.append((int(c_in), int(c_out), int(d), int(row_off), int(ch_off)))
        row_off += 3 * c_out
        ch_off += c_out
        prev = c_out
    total_rows, total_out = row_off, ch_off

    # One weight operand for all layers: channel-padded to c_max on sublanes and
    # lane-replicated to L (lane-dense; same VMEM footprint as the padded (...,1) layout,
    # but no in-kernel lane broadcasts and a single DMA descriptor).
    w_all = jnp.concatenate(
        [jnp.pad(wl, ((0, 0), (0, c_max - ci))) for wl, ci in w_rows], axis=0)
    w_all = jnp.broadcast_to(w_all[:, :, None], (total_rows, c_max, L))

    # One gamma/beta operand for all layers: (2, total_out, 1).
    gb_all = jnp.stack([jnp.concatenate(gammas), jnp.concatenate(betas)], axis=0)
    gb_all = gb_all.reshape(2, total_out, 1)

    x = x.astype(jnp.float32)

    # Advisory cost estimate so XLA schedules around the fused call.
    flops, transc = 0, 0
    for (c_in, c_out, _d, _r, _c) in layer_cfgs:
        flops += B * L * c_out * (6 * c_in + 4)   # conv MACs + BN scale/shift + ReLU
        transc += c_out                           # one rsqrt per channel
    bytes_accessed = 4 * (x.size + B * total_out * L + w_all.size + gb_all.size)

    vmem = pl.BlockSpec(memory_space=pltpu.MemorySpace.VMEM)
    kern = functools.partial(_ddc_kernel, layer_cfgs=tuple(layer_cfgs), eps=float(eps))

    return pl.pallas_call(
        kern,
        out_shape=jax.ShapeDtypeStruct((B, total_out, L), jnp.float32),
        in_specs=[vmem, vmem, vmem],
        out_specs=vmem,
        compiler_params=pltpu.CompilerParams(vmem_limit_bytes=32 * 1024 * 1024),
        cost_estimate=pl.CostEstimate(flops=int(flops), transcendentals=int(transc),
                                      bytes_accessed=int(bytes_accessed)),
    )(x, w_all, gb_all)


def ref_forward(x, params_per_layer, dilations, eps=1e-5):
    """Pure-JAX reference of the PyTorch forward (train-mode BN, bias included)."""
    outs = []
    for (w, b, g, be), d in zip(params_per_layer, dilations):
        L = x.shape[2]
        xp = jnp.pad(x, ((0, 0), (0, 0), (d, d)))
        taps = jnp.stack([xp[:, :, k * d:k * d + L] for k in range(3)], axis=-1)
        y = jnp.einsum('nclk,ock->nol', taps, w) + b[None, :, None]
        mean = jnp.mean(y, axis=(0, 2), keepdims=True)
        var = jnp.mean((y - mean) ** 2, axis=(0, 2), keepdims=True)
        y = g[None, :, None] * (y - mean) / jnp.sqrt(var + eps) + be[None, :, None]
        y = jnp.maximum(y, 0.0)
        outs.append(y)
        x = y
    return jnp.concatenate(outs, axis=1)


if __name__ == "__main__":
    B, in_channel, L = 2, 8, 128
    cycle_length = 16

    dilations = _calc_dilations(cycle_length)                       # [1, 2, 4, 8]
    out_ch_lst = [max(1, in_channel // 2 ** (i + 1)) for i in range(len(dilations))]
    out_ch_lst[-1] = out_ch_lst[-2]                                 # [4, 2, 1, 1]

    key = jax.random.PRNGKey(0)
    params, prev = [], in_channel
    for c_out in out_ch_lst:
        key, kw, kb = jax.random.split(key, 3)
        fan_in = prev * 3
        w = jax.random.normal(kw, (c_out, prev, 3), jnp.float32) / jnp.sqrt(float(fan_in))
        b = jax.random.normal(kb, (c_out,), jnp.float32) * 0.1
        g = jnp.ones((c_out,), jnp.float32)      # BatchNorm1d default weight
        be = jnp.zeros((c_out,), jnp.float32)    # BatchNorm1d default bias
        params.append((w, b, g, be))
        prev = c_out

    key, kx = jax.random.split(key)
    x = jax.random.normal(kx, (B, in_channel, L), jnp.float32)

    out = jax.block_until_ready(dynamic_dilated_conv_cat(x, params, dilations))

    ref = ref_forward(x, params, dilations)
    assert out.shape == ref.shape == (B, sum(out_ch_lst), L)
    if not bool(jnp.allclose(out, ref, atol=1e-3, rtol=1e-3)):
        raise AssertionError("Pallas kernel output does not match JAX reference")

    print("KERNEL_OK")
</pallas_src>

<mosaic_0001>
module attributes {stable_mosaic.version = 11 : i64} {
  func.func @_ddc_kernel(%arg0: memref<2x8x128xf32, #tpu.memory_space<vmem>>, %arg1: memref<24x8x128xf32, #tpu.memory_space<vmem>>, %arg2: memref<2x8x1xf32, #tpu.memory_space<vmem>>, %arg3: memref<2x8x128xf32, #tpu.memory_space<vmem>>) attributes {dimension_semantics = [], scalar_prefetch = 0 : i64, scratch_operands = 0 : i64, tpu.core_type = #tpu.core_type<tc>} {
    %c0 = arith.constant 0 : index
    %c0_0 = arith.constant 0 : index
    %c0_1 = arith.constant 0 : index
    %0 = vector.load %arg0[%c0, %c0_0, %c0_1] : memref<2x8x128xf32, #tpu.memory_space<vmem>>, vector<2x8x128xf32>
    %1 = tpu.iota {dimensions = array<i32: 2>} : vector<1x1x128xi32>
    %c1_i32 = arith.constant 1 : i32
    %2 = vector.broadcast %c1_i32 : i32 to vector<1x1x128xi32>
    %3 = arith.cmpi sge, %1, %2 : vector<1x1x128xi32>
    %c1_i32_2 = arith.constant 1 : i32
    %4 = tpu.dynamic_rotate %0 by %c1_i32_2 dim 2 : vector<2x8x128xf32>, i32 -> vector<2x8x128xf32>
    %cst = arith.constant 0.000000e+00 : f32
    %5 = vector.shape_cast %3 : vector<1x1x128xi1> to vector<1x1x128xi1>
    %6 = vector.broadcast %5 : vector<1x1x128xi1> to vector<2x8x128xi1>
    %7 = vector.broadcast %cst : f32 to vector<2x8x128xf32>
    %8 = arith.select %6, %4, %7 : vector<2x8x128xi1>, vector<2x8x128xf32>
    %c127_i32 = arith.constant 127 : i32
    %9 = vector.broadcast %c127_i32 : i32 to vector<1x1x128xi32>
    %10 = arith.cmpi slt, %1, %9 : vector<1x1x128xi32>
    %c127_i32_3 = arith.constant 127 : i32
    %11 = tpu.dynamic_rotate %0 by %c127_i32_3 dim 2 : vector<2x8x128xf32>, i32 -> vector<2x8x128xf32>
    %cst_4 = arith.constant 0.000000e+00 : f32
    %12 = vector.shape_cast %10 : vector<1x1x128xi1> to vector<1x1x128xi1>
    %13 = vector.broadcast %12 : vector<1x1x128xi1> to vector<2x8x128xi1>
    %14 = vector.broadcast %cst_4 : f32 to vector<2x8x128xf32>
    %15 = arith.select %13, %11, %14 : vector<2x8x128xi1>, vector<2x8x128xf32>
    %c0_5 = arith.constant 0 : index
    %c0_6 = arith.constant 0 : index
    %c0_7 = arith.constant 0 : index
    %16 = vector.load %arg1[%c0_5, %c0_6, %c0_7] : memref<24x8x128xf32, #tpu.memory_space<vmem>>, vector<1x8x128xf32>
    %17 = vector.shape_cast %16 : vector<1x8x128xf32> to vector<8x128xf32>
    %18 = vector.shape_cast %17 : vector<8x128xf32> to vector<1x8x128xf32>
    %19 = vector.broadcast %18 : vector<1x8x128xf32> to vector<2x8x128xf32>
    %20 = arith.mulf %8, %19 : vector<2x8x128xf32>
    %c1 = arith.constant 1 : index
    %c0_8 = arith.constant 0 : index
    %c0_9 = arith.constant 0 : index
    %21 = vector.load %arg1[%c1, %c0_8, %c0_9] : memref<24x8x128xf32, #tpu.memory_space<vmem>>, vector<1x8x128xf32>
    %22 = vector.shape_cast %21 : vector<1x8x128xf32> to vector<8x128xf32>
    %23 = vector.shape_cast %22 : vector<8x128xf32> to vector<1x8x128xf32>
    %24 = vector.broadcast %23 : vector<1x8x128xf32> to vector<2x8x128xf32>
    %25 = arith.mulf %0, %24 : vector<2x8x128xf32>
    %26 = arith.addf %20, %25 : vector<2x8x128xf32>
    %c2 = arith.constant 2 : index
    %c0_10 = arith.constant 0 : index
    %c0_11 = arith.constant 0 : index
    %27 = vector.load %arg1[%c2, %c0_10, %c0_11] : memref<24x8x128xf32, #tpu.memory_space<vmem>>, vector<1x8x128xf32>
    %28 = vector.shape_cast %27 : vector<1x8x128xf32> to vector<8x128xf32>
    %29 = vector.shape_cast %28 : vector<8x128xf32> to vector<1x8x128xf32>
    %30 = vector.broadcast %29 : vector<1x8x128xf32> to vector<2x8x128xf32>
    %31 = arith.mulf %15, %30 : vector<2x8x128xf32>
    %32 = arith.addf %26, %31 : vector<2x8x128xf32>
    %cst_12 = arith.constant dense<0.000000e+00> : vector<2x128xf32>
    %33 = vector.multi_reduction <add>, %32, %cst_12 [1] : vector<2x8x128xf32> to vector<2x128xf32>
    %34 = vector.shape_cast %33 : vector<2x128xf32> to vector<2x1x128xf32>
    %c3 = arith.constant 3 : index
    %c0_13 = arith.constant 0 : index
    %c0_14 = arith.constant 0 : index
    %35 = vector.load %arg1[%c3, %c0_13, %c0_14] : memref<24x8x128xf32, #tpu.memory_space<vmem>>, vector<1x8x128xf32>
    %36 = vector.shape_cast %35 : vector<1x8x128xf32> to vector<8x128xf32>
    %37 = vector.shape_cast %36 : vector<8x128xf32> to vector<1x8x128xf32>
    %38 = vector.broadcast %37 : vector<1x8x128xf32> to vector<2x8x128xf32>
    %39 = arith.mulf %8, %38 : vector<2x8x128xf32>
    %c4 = arith.constant 4 : index
    %c0_15 = arith.constant 0 : index
    %c0_16 = arith.constant 0 : index
    %40 = vector.load %arg1[%c4, %c0_15, %c0_16] : memref<24x8x128xf32, #tpu.memory_space<vmem>>, vector<1x8x128xf32>
    %41 = vector.shape_cast %40 : vector<1x8x128xf32> to vector<8x128xf32>
    %42 = vector.shape_cast %41 : vector<8x128xf32> to vector<1x8x128xf32>
    %43 = vector.broadcast %42 : vector<1x8x128xf32> to vector<2x8x128xf32>
    %44 = arith.mulf %0, %43 : vector<2x8x128xf32>
    %45 = arith.addf %39, %44 : vector<2x8x128xf32>
    %c5 = arith.constant 5 : index
    %c0_17 = arith.constant 0 : index
    %c0_18 = arith.constant 0 : index
    %46 = vector.load %arg1[%c5, %c0_17, %c0_18] : memref<24x8x128xf32, #tpu.memory_space<vmem>>, vector<1x8x128xf32>
    %47 = vector.shape_cast %46 : vector<1x8x128xf32> to vector<8x128xf32>
    %48 = vector.shape_cast %47 : vector<8x128xf32> to vector<1x8x128xf32>
    %49 = vector.broadcast %48 : vector<1x8x128xf32> to vector<2x8x128xf32>
    %50 = arith.mulf %15, %49 : vector<2x8x128xf32>
    %51 = arith.addf %45, %50 : vector<2x8x128xf32>
    %cst_19 = arith.constant dense<0.000000e+00> : vector<2x128xf32>
    %52 = vector.multi_reduction <add>, %51, %cst_19 [1] : vector<2x8x128xf32> to vector<2x128xf32>
    %53 = vector.shape_cast %52 : vector<2x128xf32> to vector<2x1x128xf32>
    %c6 = arith.constant 6 : index
    %c0_20 = arith.constant 0 : index
    %c0_21 = arith.constant 0 : index
    %54 = vector.load %arg1[%c6, %c0_20, %c0_21] : memref<24x8x128xf32, #tpu.memory_space<vmem>>, vector<1x8x128xf32>
    %55 = vector.shape_cast %54 : vector<1x8x128xf32> to vector<8x128xf32>
    %56 = vector.shape_cast %55 : vector<8x128xf32> to vector<1x8x128xf32>
    %57 = vector.broadcast %56 : vector<1x8x128xf32> to vector<2x8x128xf32>
    %58 = arith.mulf %8, %57 : vector<2x8x128xf32>
    %c7 = arith.constant 7 : index
    %c0_22 = arith.constant 0 : index
    %c0_23 = arith.constant 0 : index
    %59 = vector.load %arg1[%c7, %c0_22, %c0_23] : memref<24x8x128xf32, #tpu.memory_space<vmem>>, vector<1x8x128xf32>
    %60 = vector.shape_cast %59 : vector<1x8x128xf32> to vector<8x128xf32>
    %61 = vector.shape_cast %60 : vector<8x128xf32> to vector<1x8x128xf32>
    %62 = vector.broadcast %61 : vector<1x8x128xf32> to vector<2x8x128xf32>
    %63 = arith.mulf %0, %62 : vector<2x8x128xf32>
    %64 = arith.addf %58, %63 : vector<2x8x128xf32>
    %c8 = arith.constant 8 : index
    %c0_24 = arith.constant 0 : index
    %c0_25 = arith.constant 0 : index
    %65 = vector.load %arg1[%c8, %c0_24, %c0_25] : memref<24x8x128xf32, #tpu.memory_space<vmem>>, vector<1x8x128xf32>
    %66 = vector.shape_cast %65 : vector<1x8x128xf32> to vector<8x128xf32>
    %67 = vector.shape_cast %66 : vector<8x128xf32> to vector<1x8x128xf32>
    %68 = vector.broadcast %67 : vector<1x8x128xf32> to vector<2x8x128xf32>
    %69 = arith.mulf %15, %68 : vector<2x8x128xf32>
    %70 = arith.addf %64, %69 : vector<2x8x128xf32>
    %cst_26 = arith.constant dense<0.000000e+00> : vector<2x128xf32>
    %71 = vector.multi_reduction <add>, %70, %cst_26 [1] : vector<2x8x128xf32> to vector<2x128xf32>
    %72 = vector.shape_cast %71 : vector<2x128xf32> to vector<2x1x128xf32>
    %c9 = arith.constant 9 : index
    %c0_27 = arith.constant 0 : index
    %c0_28 = arith.constant 0 : index
    %73 = vector.load %arg1[%c9, %c0_27, %c0_28] : memref<24x8x128xf32, #tpu.memory_space<vmem>>, vector<1x8x128xf32>
    %74 = vector.shape_cast %73 : vector<1x8x128xf32> to vector<8x128xf32>
    %75 = vector.shape_cast %74 : vector<8x128xf32> to vector<1x8x128xf32>
    %76 = vector.broadcast %75 : vector<1x8x128xf32> to vector<2x8x128xf32>
    %77 = arith.mulf %8, %76 : vector<2x8x128xf32>
    %c10 = arith.constant 10 : index
    %c0_29 = arith.constant 0 : index
    %c0_30 = arith.constant 0 : index
    %78 = vector.load %arg1[%c10, %c0_29, %c0_30] : memref<24x8x128xf32, #tpu.memory_space<vmem>>, vector<1x8x128xf32>
    %79 = vector.shape_cast %78 : vector<1x8x128xf32> to vector<8x128xf32>
    %80 = vector.shape_cast %79 : vector<8x128xf32> to vector<1x8x128xf32>
    %81 = vector.broadcast %80 : vector<1x8x128xf32> to vector<2x8x128xf32>
    %82 = arith.mulf %0, %81 : vector<2x8x128xf32>
    %83 = arith.addf %77, %82 : vector<2x8x128xf32>
    %c11 = arith.constant 11 : index
    %c0_31 = arith.constant 0 : index
    %c0_32 = arith.constant 0 : index
    %84 = vector.load %arg1[%c11, %c0_31, %c0_32] : memref<24x8x128xf32, #tpu.memory_space<vmem>>, vector<1x8x128xf32>
    %85 = vector.shape_cast %84 : vector<1x8x128xf32> to vector<8x128xf32>
    %86 = vector.shape_cast %85 : vector<8x128xf32> to vector<1x8x128xf32>
    %87 = vector.broadcast %86 : vector<1x8x128xf32> to vector<2x8x128xf32>
    %88 = arith.mulf %15, %87 : vector<2x8x128xf32>
    %89 = arith.addf %83, %88 : vector<2x8x128xf32>
    %cst_33 = arith.constant dense<0.000000e+00> : vector<2x128xf32>
    %90 = vector.multi_reduction <add>, %89, %cst_33 [1] : vector<2x8x128xf32> to vector<2x128xf32>
    %91 = vector.shape_cast %90 : vector<2x128xf32> to vector<2x1x128xf32>
    %92 = tpu.concatenate %34, %53, %72, %91 in 1 : vector<2x1x128xf32>, vector<2x1x128xf32>, vector<2x1x128xf32>, vector<2x1x128xf32> -> vector<2x4x128xf32>
    %cst_34 = arith.constant dense<0.000000e+00> : vector<2x4xf32>
    %93 = vector.multi_reduction <add>, %92, %cst_34 [2] : vector<2x4x128xf32> to vector<2x4xf32>
    %94 = vector.shape_cast %93 : vector<2x4xf32> to vector<2x4x1xf32>
    %cst_35 = arith.constant dense<0.000000e+00> : vector<4x1xf32>
    %95 = vector.multi_reduction <add>, %94, %cst_35 [0] : vector<2x4x1xf32> to vector<4x1xf32>
    %96 = vector.shape_cast %95 : vector<4x1xf32> to vector<1x4x1xf32>
    %97 = arith.mulf %92, %92 : vector<2x4x128xf32>
    %cst_36 = arith.constant dense<0.000000e+00> : vector<2x4xf32>
    %98 = vector.multi_reduction <add>, %97, %cst_36 [2] : vector<2x4x128xf32> to vector<2x4xf32>
    %99 = vector.shape_cast %98 : vector<2x4xf32> to vector<2x4x1xf32>
    %cst_37 = arith.constant dense<0.000000e+00> : vector<4x1xf32>
    %100 = vector.multi_reduction <add>, %99, %cst_37 [0] : vector<2x4x1xf32> to vector<4x1xf32>
    %101 = vector.shape_cast %100 : vector<4x1xf32> to vector<1x4x1xf32>
    %cst_38 = arith.constant 3.906250e-03 : f32
    %102 = vector.broadcast %cst_38 : f32 to vector<1x4x1xf32>
    %103 = arith.mulf %96, %102 : vector<1x4x1xf32>
    %cst_39 = arith.constant 3.906250e-03 : f32
    %104 = vector.broadcast %cst_39 : f32 to vector<1x4x1xf32>
    %105 = arith.mulf %101, %104 : vector<1x4x1xf32>
    %106 = arith.mulf %103, %103 : vector<1x4x1xf32>
    %107 = arith.subf %105, %106 : vector<1x4x1xf32>
    %cst_40 = arith.constant 0.000000e+00 : f32
    %108 = vector.broadcast %cst_40 : f32 to vector<1x4x1xf32>
    %109 = arith.maximumf %107, %108 : vector<1x4x1xf32>
    %c0_41 = arith.constant 0 : index
    %c0_42 = arith.constant 0 : index
    %c0_43 = arith.constant 0 : index
    %110 = vector.load %arg2[%c0_41, %c0_42, %c0_43] : memref<2x8x1xf32, #tpu.memory_space<vmem>>, vector<1x4x1xf32>
    %111 = vector.shape_cast %110 : vector<1x4x1xf32> to vector<4x1xf32>
    %c1_44 = arith.constant 1 : index
    %c0_45 = arith.constant 0 : index
    %c0_46 = arith.constant 0 : index
    %112 = vector.load %arg2[%c1_44, %c0_45, %c0_46] : memref<2x8x1xf32, #tpu.memory_space<vmem>>, vector<1x4x1xf32>
    %113 = vector.shape_cast %112 : vector<1x4x1xf32> to vector<4x1xf32>
    %cst_47 = arith.constant 9.99999974E-6 : f32
    %114 = vector.broadcast %cst_47 : f32 to vector<1x4x1xf32>
    %115 = arith.addf %109, %114 : vector<1x4x1xf32>
    %116 = math.rsqrt %115 : vector<1x4x1xf32>
    %117 = vector.shape_cast %111 : vector<4x1xf32> to vector<1x4x1xf32>
    %118 = arith.mulf %117, %116 : vector<1x4x1xf32>
    %119 = arith.mulf %103, %118 : vector<1x4x1xf32>
    %120 = vector.shape_cast %113 : vector<4x1xf32> to vector<1x4x1xf32>
    %121 = arith.subf %120, %119 : vector<1x4x1xf32>
    %122 = vector.broadcast %118 : vector<1x4x1xf32> to vector<2x4x128xf32>
    %123 = arith.mulf %92, %122 : vector<2x4x128xf32>
    %124 = vector.broadcast %121 : vector<1x4x1xf32> to vector<2x4x128xf32>
    %125 = arith.addf %123, %124 : vector<2x4x128xf32>
    %cst_48 = arith.constant 0.000000e+00 : f32
    %126 = vector.broadcast %cst_48 : f32 to vector<2x4x128xf32>
    %127 = arith.maximumf %125, %126 : vector<2x4x128xf32>
    %c0_49 = arith.constant 0 : index
    %c0_50 = arith.constant 0 : index
    %c0_51 = arith.constant 0 : index
    %128 = vector.load %arg3[%c0_49, %c0_50, %c0_51] : memref<2x8x128xf32, #tpu.memory_space<vmem>>, vector<2x4x128xf32>
    tpu.vector_store %arg3[%c0_49, %c0_50, %c0_51], %127 {strides = array<i32>} : memref<2x8x128xf32, #tpu.memory_space<vmem>>, vector<2x4x128xf32>,
    %c2_i32 = arith.constant 2 : i32
    %129 = vector.broadcast %c2_i32 : i32 to vector<1x1x128xi32>
    %130 = arith.cmpi sge, %1, %129 : vector<1x1x128xi32>
    %c2_i32_52 = arith.constant 2 : i32
    %131 = tpu.dynamic_rotate %127 by %c2_i32_52 dim 2 : vector<2x4x128xf32>, i32 -> vector<2x4x128xf32>
    %cst_53 = arith.constant 0.000000e+00 : f32
    %132 = vector.shape_cast %130 : vector<1x1x128xi1> to vector<1x1x128xi1>
    %133 = vector.broadcast %132 : vector<1x1x128xi1> to vector<2x4x128xi1>
    %134 = vector.broadcast %cst_53 : f32 to vector<2x4x128xf32>
    %135 = arith.select %133, %131, %134 : vector<2x4x128xi1>, vector<2x4x128xf32>
    %c126_i32 = arith.constant 126 : i32
    %136 = vector.broadcast %c126_i32 : i32 to vector<1x1x128xi32>
    %137 = arith.cmpi slt, %1, %136 : vector<1x1x128xi32>
    %c126_i32_54 = arith.constant 126 : i32
    %138 = tpu.dynamic_rotate %127 by %c126_i32_54 dim 2 : vector<2x4x128xf32>, i32 -> vector<2x4x128xf32>
    %cst_55 = arith.constant 0.000000e+00 : f32
    %139 = vector.shape_cast %137 : vector<1x1x128xi1> to vector<1x1x128xi1>
    %140 = vector.broadcast %139 : vector<1x1x128xi1> to vector<2x4x128xi1>
    %141 = vector.broadcast %cst_55 : f32 to vector<2x4x128xf32>
    %142 = arith.select %140, %138, %141 : vector<2x4x128xi1>, vector<2x4x128xf32>
    %c12 = arith.constant 12 : index
    %c0_56 = arith.constant 0 : index
    %c0_57 = arith.constant 0 : index
    %143 = vector.load %arg1[%c12, %c0_56, %c0_57] : memref<24x8x128xf32, #tpu.memory_space<vmem>>, vector<1x4x128xf32>
    %144 = vector.shape_cast %143 : vector<1x4x128xf32> to vector<4x128xf32>
    %145 = vector.shape_cast %144 : vector<4x128xf32> to vector<1x4x128xf32>
    %146 = vector.broadcast %145 : vector<1x4x128xf32> to vector<2x4x128xf32>
    %147 = arith.mulf %135, %146 : vector<2x4x128xf32>
    %c13 = arith.constant 13 : index
    %c0_58 = arith.constant 0 : index
    %c0_59 = arith.constant 0 : index
    %148 = vector.load %arg1[%c13, %c0_58, %c0_59] : memref<24x8x128xf32, #tpu.memory_space<vmem>>, vector<1x4x128xf32>
    %149 = vector.shape_cast %148 : vector<1x4x128xf32> to vector<4x128xf32>
    %150 = vector.shape_cast %149 : vector<4x128xf32> to vector<1x4x128xf32>
    %151 = vector.broadcast %150 : vector<1x4x128xf32> to vector<2x4x128xf32>
    %152 = arith.mulf %127, %151 : vector<2x4x128xf32>
    %153 = arith.addf %147, %152 : vector<2x4x128xf32>
    %c14 = arith.constant 14 : index
    %c0_60 = arith.constant 0 : index
    %c0_61 = arith.constant 0 : index
    %154 = vector.load %arg1[%c14, %c0_60, %c0_61] : memref<24x8x128xf32, #tpu.memory_space<vmem>>, vector<1x4x128xf32>
    %155 = vector.shape_cast %154 : vector<1x4x128xf32> to vector<4x128xf32>
    %156 = vector.shape_cast %155 : vector<4x128xf32> to vector<1x4x128xf32>
    %157 = vector.broadcast %156 : vector<1x4x128xf32> to vector<2x4x128xf32>
    %158 = arith.mulf %142, %157 : vector<2x4x128xf32>
    %159 = arith.addf %153, %158 : vector<2x4x128xf32>
    %cst_62 = arith.constant dense<0.000000e+00> : vector<2x128xf32>
    %160 = vector.multi_reduction <add>, %159, %cst_62 [1] : vector<2x4x128xf32> to vector<2x128xf32>
    %161 = vector.shape_cast %160 : vector<2x128xf32> to vector<2x1x128xf32>
    %c15 = arith.constant 15 : index
    %c0_63 = arith.constant 0 : index
    %c0_64 = arith.constant 0 : index
    %162 = vector.load %arg1[%c15, %c0_63, %c0_64] : memref<24x8x128xf32, #tpu.memory_space<vmem>>, vector<1x4x128xf32>
    %163 = vector.shape_cast %162 : vector<1x4x128xf32> to vector<4x128xf32>
    %164 = vector.shape_cast %163 : vector<4x128xf32> to vector<1x4x128xf32>
    %165 = vector.broadcast %164 : vector<1x4x128xf32> to vector<2x4x128xf32>
    %166 = arith.mulf %135, %165 : vector<2x4x128xf32>
    %c16 = arith.constant 16 : index
    %c0_65 = arith.constant 0 : index
    %c0_66 = arith.constant 0 : index
    %167 = vector.load %arg1[%c16, %c0_65, %c0_66] : memref<24x8x128xf32, #tpu.memory_space<vmem>>, vector<1x4x128xf32>
    %168 = vector.shape_cast %167 : vector<1x4x128xf32> to vector<4x128xf32>
    %169 = vector.shape_cast %168 : vector<4x128xf32> to vector<1x4x128xf32>
    %170 = vector.broadcast %169 : vector<1x4x128xf32> to vector<2x4x128xf32>
    %171 = arith.mulf %127, %170 : vector<2x4x128xf32>
    %172 = arith.addf %166, %171 : vector<2x4x128xf32>
    %c17 = arith.constant 17 : index
    %c0_67 = arith.constant 0 : index
    %c0_68 = arith.constant 0 : index
    %173 = vector.load %arg1[%c17, %c0_67, %c0_68] : memref<24x8x128xf32, #tpu.memory_space<vmem>>, vector<1x4x128xf32>
    %174 = vector.shape_cast %173 : vector<1x4x128xf32> to vector<4x128xf32>
    %175 = vector.shape_cast %174 : vector<4x128xf32> to vector<1x4x128xf32>
    %176 = vector.broadcast %175 : vector<1x4x128xf32> to vector<2x4x128xf32>
    %177 = arith.mulf %142, %176 : vector<2x4x128xf32>
    %178 = arith.addf %172, %177 : vector<2x4x128xf32>
    %cst_69 = arith.constant dense<0.000000e+00> : vector<2x128xf32>
    %179 = vector.multi_reduction <add>, %178, %cst_69 [1] : vector<2x4x128xf32> to vector<2x128xf32>
    %180 = vector.shape_cast %179 : vector<2x128xf32> to vector<2x1x128xf32>
    %181 = tpu.concatenate %161, %180 in 1 : vector<2x1x128xf32>, vector<2x1x128xf32> -> vector<2x2x128xf32>
    %cst_70 = arith.constant dense<0.000000e+00> : vector<2x2xf32>
    %182 = vector.multi_reduction <add>, %181, %cst_70 [2] : vector<2x2x128xf32> to vector<2x2xf32>
    %183 = vector.shape_cast %182 : vector<2x2xf32> to vector<2x2x1xf32>
    %cst_71 = arith.constant dense<0.000000e+00> : vector<2x1xf32>
    %184 = vector.multi_reduction <add>, %183, %cst_71 [0] : vector<2x2x1xf32> to vector<2x1xf32>
    %185 = vector.shape_cast %184 : vector<2x1xf32> to vector<1x2x1xf32>
    %186 = arith.mulf %181, %181 : vector<2x2x128xf32>
    %cst_72 = arith.constant dense<0.000000e+00> : vector<2x2xf32>
    %187 = vector.multi_reduction <add>, %186, %cst_72 [2] : vector<2x2x128xf32> to vector<2x2xf32>
    %188 = vector.shape_cast %187 : vector<2x2xf32> to vector<2x2x1xf32>
    %cst_73 = arith.constant dense<0.000000e+00> : vector<2x1xf32>
    %189 = vector.multi_reduction <add>, %188, %cst_73 [0] : vector<2x2x1xf32> to vector<2x1xf32>
    %190 = vector.shape_cast %189 : vector<2x1xf32> to vector<1x2x1xf32>
    %cst_74 = arith.constant 3.906250e-03 : f32
    %191 = vector.broadcast %cst_74 : f32 to vector<1x2x1xf32>
    %192 = arith.mulf %185, %191 : vector<1x2x1xf32>
    %cst_75 = arith.constant 3.906250e-03 : f32
    %193 = vector.broadcast %cst_75 : f32 to vector<1x2x1xf32>
    %194 = arith.mulf %190, %193 : vector<1x2x1xf32>
    %195 = arith.mulf %192, %192 : vector<1x2x1xf32>
    %196 = arith.subf %194, %195 : vector<1x2x1xf32>
    %cst_76 = arith.constant 0.000000e+00 : f32
    %197 = vector.broadcast %cst_76 : f32 to vector<1x2x1xf32>
    %198 = arith.maximumf %196, %197 : vector<1x2x1xf32>
    %c0_77 = arith.constant 0 : index
    %c4_78 = arith.constant 4 : index
    %c0_79 = arith.constant 0 : index
    %199 = vector.load %arg2[%c0_77, %c4_78, %c0_79] : memref<2x8x1xf32, #tpu.memory_space<vmem>>, vector<1x2x1xf32>
    %200 = vector.shape_cast %199 : vector<1x2x1xf32> to vector<2x1xf32>
    %c1_80 = arith.constant 1 : index
    %c4_81 = arith.constant 4 : index
    %c0_82 = arith.constant 0 : index
    %201 = vector.load %arg2[%c1_80, %c4_81, %c0_82] : memref<2x8x1xf32, #tpu.memory_space<vmem>>, vector<1x2x1xf32>
    %202 = vector.shape_cast %201 : vector<1x2x1xf32> to vector<2x1xf32>
    %cst_83 = arith.constant 9.99999974E-6 : f32
    %203 = vector.broadcast %cst_83 : f32 to vector<1x2x1xf32>
    %204 = arith.addf %198, %203 : vector<1x2x1xf32>
    %205 = math.rsqrt %204 : vector<1x2x1xf32>
    %206 = vector.shape_cast %200 : vector<2x1xf32> to vector<1x2x1xf32>
    %207 = arith.mulf %206, %205 : vector<1x2x1xf32>
    %208 = arith.mulf %192, %207 : vector<1x2x1xf32>
    %209 = vector.shape_cast %202 : vector<2x1xf32> to vector<1x2x1xf32>
    %210 = arith.subf %209, %208 : vector<1x2x1xf32>
    %211 = vector.broadcast %207 : vector<1x2x1xf32> to vector<2x2x128xf32>
    %212 = arith.mulf %181, %211 : vector<2x2x128xf32>
    %213 = vector.broadcast %210 : vector<1x2x1xf32> to vector<2x2x128xf32>
    %214 = arith.addf %212, %213 : vector<2x2x128xf32>
    %cst_84 = arith.constant 0.000000e+00 : f32
    %215 = vector.broadcast %cst_84 : f32 to vector<2x2x128xf32>
    %216 = arith.maximumf %214, %215 : vector<2x2x128xf32>
    %c0_85 = arith.constant 0 : index
    %c4_86 = arith.constant 4 : index
    %c0_87 = arith.constant 0 : index
    %217 = vector.load %arg3[%c0_85, %c4_86, %c0_87] : memref<2x8x128xf32, #tpu.memory_space<vmem>>, vector<2x2x128xf32>
    tpu.vector_store %arg3[%c0_85, %c4_86, %c0_87], %216 {strides = array<i32>} : memref<2x8x128xf32, #tpu.memory_space<vmem>>, vector<2x2x128xf32>,
    %c4_i32 = arith.constant 4 : i32
    %218 = vector.broadcast %c4_i32 : i32 to vector<1x1x128xi32>
    %219 = arith.cmpi sge, %1, %218 : vector<1x1x128xi32>
    %c4_i32_88 = arith.constant 4 : i32
    %220 = tpu.dynamic_rotate %216 by %c4_i32_88 dim 2 : vector<2x2x128xf32>, i32 -> vector<2x2x128xf32>
    %cst_89 = arith.constant 0.000000e+00 : f32
    %221 = vector.shape_cast %219 : vector<1x1x128xi1> to vector<1x1x128xi1>
    %222 = vector.broadcast %221 : vector<1x1x128xi1> to vector<2x2x128xi1>
    %223 = vector.broadcast %cst_89 : f32 to vector<2x2x128xf32>
    %224 = arith.select %222, %220, %223 : vector<2x2x128xi1>, vector<2x2x128xf32>
    %c124_i32 = arith.constant 124 : i32
    %225 = vector.broadcast %c124_i32 : i32 to vector<1x1x128xi32>
    %226 = arith.cmpi slt, %1, %225 : vector<1x1x128xi32>
    %c124_i32_90 = arith.constant 124 : i32
    %227 = tpu.dynamic_rotate %216 by %c124_i32_90 dim 2 : vector<2x2x128xf32>, i32 -> vector<2x2x128xf32>
    %cst_91 = arith.constant 0.000000e+00 : f32
    %228 = vector.shape_cast %226 : vector<1x1x128xi1> to vector<1x1x128xi1>
    %229 = vector.broadcast %228 : vector<1x1x128xi1> to vector<2x2x128xi1>
    %230 = vector.broadcast %cst_91 : f32 to vector<2x2x128xf32>
    %231 = arith.select %229, %227, %230 : vector<2x2x128xi1>, vector<2x2x128xf32>
    %c18 = arith.constant 18 : index
    %c0_92 = arith.constant 0 : index
    %c0_93 = arith.constant 0 : index
    %232 = vector.load %arg1[%c18, %c0_92, %c0_93] : memref<24x8x128xf32, #tpu.memory_space<vmem>>, vector<1x2x128xf32>
    %233 = vector.shape_cast %232 : vector<1x2x128xf32> to vector<2x128xf32>
    %234 = vector.shape_cast %233 : vector<2x128xf32> to vector<1x2x128xf32>
    %235 = vector.broadcast %234 : vector<1x2x128xf32> to vector<2x2x128xf32>
    %236 = arith.mulf %224, %235 : vector<2x2x128xf32>
    %c19 = arith.constant 19 : index
    %c0_94 = arith.constant 0 : index
    %c0_95 = arith.constant 0 : index
    %237 = vector.load %arg1[%c19, %c0_94, %c0_95] : memref<24x8x128xf32, #tpu.memory_space<vmem>>, vector<1x2x128xf32>
    %238 = vector.shape_cast %237 : vector<1x2x128xf32> to vector<2x128xf32>
    %239 = vector.shape_cast %238 : vector<2x128xf32> to vector<1x2x128xf32>
    %240 = vector.broadcast %239 : vector<1x2x128xf32> to vector<2x2x128xf32>
    %241 = arith.mulf %216, %240 : vector<2x2x128xf32>
    %242 = arith.addf %236, %241 : vector<2x2x128xf32>
    %c20 = arith.constant 20 : index
    %c0_96 = arith.constant 0 : index
    %c0_97 = arith.constant 0 : index
    %243 = vector.load %arg1[%c20, %c0_96, %c0_97] : memref<24x8x128xf32, #tpu.memory_space<vmem>>, vector<1x2x128xf32>
    %244 = vector.shape_cast %243 : vector<1x2x128xf32> to vector<2x128xf32>
    %245 = vector.shape_cast %244 : vector<2x128xf32> to vector<1x2x128xf32>
    %246 = vector.broadcast %245 : vector<1x2x128xf32> to vector<2x2x128xf32>
    %247 = arith.mulf %231, %246 : vector<2x2x128xf32>
    %248 = arith.addf %242, %247 : vector<2x2x128xf32>
    %cst_98 = arith.constant dense<0.000000e+00> : vector<2x128xf32>
    %249 = vector.multi_reduction <add>, %248, %cst_98 [1] : vector<2x2x128xf32> to vector<2x128xf32>
    %250 = vector.shape_cast %249 : vector<2x128xf32> to vector<2x1x128xf32>
    %cst_99 = arith.constant dense<0.000000e+00> : vector<2x1xf32>
    %251 = vector.multi_reduction <add>, %250, %cst_99 [2] : vector<2x1x128xf32> to vector<2x1xf32>
    %252 = vector.shape_cast %251 : vector<2x1xf32> to vector<2x1x1xf32>
    %cst_100 = arith.constant dense<0.000000e+00> : vector<1x1xf32>
    %253 = vector.multi_reduction <add>, %252, %cst_100 [0] : vector<2x1x1xf32> to vector<1x1xf32>
    %254 = vector.shape_cast %253 : vector<1x1xf32> to vector<1x1x1xf32>
    %255 = arith.mulf %250, %250 : vector<2x1x128xf32>
    %cst_101 = arith.constant dense<0.000000e+00> : vector<2x1xf32>
    %256 = vector.multi_reduction <add>, %255, %cst_101 [2] : vector<2x1x128xf32> to vector<2x1xf32>
    %257 = vector.shape_cast %256 : vector<2x1xf32> to vector<2x1x1xf32>
    %cst_102 = arith.constant dense<0.000000e+00> : vector<1x1xf32>
    %258 = vector.multi_reduction <add>, %257, %cst_102 [0] : vector<2x1x1xf32> to vector<1x1xf32>
    %259 = vector.shape_cast %258 : vector<1x1xf32> to vector<1x1x1xf32>
    %cst_103 = arith.constant 3.906250e-03 : f32
    %260 = vector.broadcast %cst_103 : f32 to vector<1x1x1xf32>
    %261 = arith.mulf %254, %260 : vector<1x1x1xf32>
    %cst_104 = arith.constant 3.906250e-03 : f32
    %262 = vector.broadcast %cst_104 : f32 to vector<1x1x1xf32>
    %263 = arith.mulf %259, %262 : vector<1x1x1xf32>
    %264 = arith.mulf %261, %261 : vector<1x1x1xf32>
    %265 = arith.subf %263, %264 : vector<1x1x1xf32>
    %cst_105 = arith.constant 0.000000e+00 : f32
    %266 = vector.broadcast %cst_105 : f32 to vector<1x1x1xf32>
    %267 = arith.maximumf %265, %266 : vector<1x1x1xf32>
    %c0_106 = arith.constant 0 : index
    %c6_107 = arith.constant 6 : index
    %c0_108 = arith.constant 0 : index
    %268 = vector.load %arg2[%c0_106, %c6_107, %c0_108] : memref<2x8x1xf32, #tpu.memory_space<vmem>>, vector<1x1x1xf32>
    %269 = vector.shape_cast %268 : vector<1x1x1xf32> to vector<1x1xf32>
    %c1_109 = arith.constant 1 : index
    %c6_110 = arith.constant 6 : index
    %c0_111 = arith.constant 0 : index
    %270 = vector.load %arg2[%c1_109, %c6_110, %c0_111] : memref<2x8x1xf32, #tpu.memory_space<vmem>>, vector<1x1x1xf32>
    %271 = vector.shape_cast %270 : vector<1x1x1xf32> to vector<1x1xf32>
    %cst_112 = arith.constant 9.99999974E-6 : f32
    %272 = vector.broadcast %cst_112 : f32 to vector<1x1x1xf32>
    %273 = arith.addf %267, %272 : vector<1x1x1xf32>
    %274 = math.rsqrt %273 : vector<1x1x1xf32>
    %275 = vector.shape_cast %269 : vector<1x1xf32> to vector<1x1x1xf32>
    %276 = arith.mulf %275, %274 : vector<1x1x1xf32>
    %277 = arith.mulf %261, %276 : vector<1x1x1xf32>
    %278 = vector.shape_cast %271 : vector<1x1xf32> to vector<1x1x1xf32>
    %279 = arith.subf %278, %277 : vector<1x1x1xf32>
    %280 = vector.broadcast %276 : vector<1x1x1xf32> to vector<2x1x128xf32>
    %281 = arith.mulf %250, %280 : vector<2x1x128xf32>
    %282 = vector.broadcast %279 : vector<1x1x1xf32> to vector<2x1x128xf32>
    %283 = arith.addf %281, %282 : vector<2x1x128xf32>
    %cst_113 = arith.constant 0.000000e+00 : f32
    %284 = vector.broadcast %cst_113 : f32 to vector<2x1x128xf32>
    %285 = arith.maximumf %283, %284 : vector<2x1x128xf32>
    %c0_114 = arith.constant 0 : index
    %c6_115 = arith.constant 6 : index
    %c0_116 = arith.constant 0 : index
    %286 = vector.load %arg3[%c0_114, %c6_115, %c0_116] : memref<2x8x128xf32, #tpu.memory_space<vmem>>, vector<2x1x128xf32>
    tpu.vector_store %arg3[%c0_114, %c6_115, %c0_116], %285 {strides = array<i32>} : memref<2x8x128xf32, #tpu.memory_space<vmem>>, vector<2x1x128xf32>,
    %c8_i32 = arith.constant 8 : i32
    %287 = vector.broadcast %c8_i32 : i32 to vector<1x1x128xi32>
    %288 = arith.cmpi sge, %1, %287 : vector<1x1x128xi32>
    %c8_i32_117 = arith.constant 8 : i32
    %289 = tpu.dynamic_rotate %285 by %c8_i32_117 dim 2 : vector<2x1x128xf32>, i32 -> vector<2x1x128xf32>
    %cst_118 = arith.constant 0.000000e+00 : f32
    %290 = vector.shape_cast %288 : vector<1x1x128xi1> to vector<1x1x128xi1>
    %291 = vector.broadcast %290 : vector<1x1x128xi1> to vector<2x1x128xi1>
    %292 = vector.broadcast %cst_118 : f32 to vector<2x1x128xf32>
    %293 = arith.select %291, %289, %292 : vector<2x1x128xi1>, vector<2x1x128xf32>
    %c120_i32 = arith.constant 120 : i32
    %294 = vector.broadcast %c120_i32 : i32 to vector<1x1x128xi32>
    %295 = arith.cmpi slt, %1, %294 : vector<1x1x128xi32>
    %c120_i32_119 = arith.constant 120 : i32
    %296 = tpu.dynamic_rotate %285 by %c120_i32_119 dim 2 : vector<2x1x128xf32>, i32 -> vector<2x1x128xf32>
    %cst_120 = arith.constant 0.000000e+00 : f32
    %297 = vector.shape_cast %295 : vector<1x1x128xi1> to vector<1x1x128xi1>
    %298 = vector.broadcast %297 : vector<1x1x128xi1> to vector<2x1x128xi1>
    %299 = vector.broadcast %cst_120 : f32 to vector<2x1x128xf32>
    %300 = arith.select %298, %296, %299 : vector<2x1x128xi1>, vector<2x1x128xf32>
    %c21 = arith.constant 21 : index
    %c0_121 = arith.constant 0 : index
    %c0_122 = arith.constant 0 : index
    %301 = vector.load %arg1[%c21, %c0_121, %c0_122] : memref<24x8x128xf32, #tpu.memory_space<vmem>>, vector<1x1x128xf32>
    %302 = vector.shape_cast %301 : vector<1x1x128xf32> to vector<1x128xf32>
    %303 = vector.shape_cast %302 : vector<1x128xf32> to vector<1x1x128xf32>
    %304 = vector.broadcast %303 : vector<1x1x128xf32> to vector<2x1x128xf32>
    %305 = arith.mulf %293, %304 : vector<2x1x128xf32>
    %c22 = arith.constant 22 : index
    %c0_123 = arith.constant 0 : index
    %c0_124 = arith.constant 0 : index
    %306 = vector.load %arg1[%c22, %c0_123, %c0_124] : memref<24x8x128xf32, #tpu.memory_space<vmem>>, vector<1x1x128xf32>
    %307 = vector.shape_cast %306 : vector<1x1x128xf32> to vector<1x128xf32>
    %308 = vector.shape_cast %307 : vector<1x128xf32> to vector<1x1x128xf32>
    %309 = vector.broadcast %308 : vector<1x1x128xf32> to vector<2x1x128xf32>
    %310 = arith.mulf %285, %309 : vector<2x1x128xf32>
    %311 = arith.addf %305, %310 : vector<2x1x128xf32>
    %c23 = arith.constant 23 : index
    %c0_125 = arith.constant 0 : index
    %c0_126 = arith.constant 0 : index
    %312 = vector.load %arg1[%c23, %c0_125, %c0_126] : memref<24x8x128xf32, #tpu.memory_space<vmem>>, vector<1x1x128xf32>
    %313 = vector.shape_cast %312 : vector<1x1x128xf32> to vector<1x128xf32>
    %314 = vector.shape_cast %313 : vector<1x128xf32> to vector<1x1x128xf32>
    %315 = vector.broadcast %314 : vector<1x1x128xf32> to vector<2x1x128xf32>
    %316 = arith.mulf %300, %315 : vector<2x1x128xf32>
    %317 = arith.addf %311, %316 : vector<2x1x128xf32>
    %cst_127 = arith.constant dense<0.000000e+00> : vector<2x128xf32>
    %318 = vector.multi_reduction <add>, %317, %cst_127 [1] : vector<2x1x128xf32> to vector<2x128xf32>
    %319 = vector.shape_cast %318 : vector<2x128xf32> to vector<2x1x128xf32>
    %cst_128 = arith.constant dense<0.000000e+00> : vector<2x1xf32>
    %320 = vector.multi_reduction <add>, %319, %cst_128 [2] : vector<2x1x128xf32> to vector<2x1xf32>
    %321 = vector.shape_cast %320 : vector<2x1xf32> to vector<2x1x1xf32>
    %cst_129 = arith.constant dense<0.000000e+00> : vector<1x1xf32>
    %322 = vector.multi_reduction <add>, %321, %cst_129 [0] : vector<2x1x1xf32> to vector<1x1xf32>
    %323 = vector.shape_cast %322 : vector<1x1xf32> to vector<1x1x1xf32>
    %324 = arith.mulf %319, %319 : vector<2x1x128xf32>
    %cst_130 = arith.constant dense<0.000000e+00> : vector<2x1xf32>
    %325 = vector.multi_reduction <add>, %324, %cst_130 [2] : vector<2x1x128xf32> to vector<2x1xf32>
    %326 = vector.shape_cast %325 : vector<2x1xf32> to vector<2x1x1xf32>
    %cst_131 = arith.constant dense<0.000000e+00> : vector<1x1xf32>
    %327 = vector.multi_reduction <add>, %326, %cst_131 [0] : vector<2x1x1xf32> to vector<1x1xf32>
    %328 = vector.shape_cast %327 : vector<1x1xf32> to vector<1x1x1xf32>
    %cst_132 = arith.constant 3.906250e-03 : f32
    %329 = vector.broadcast %cst_132 : f32 to vector<1x1x1xf32>
    %330 = arith.mulf %323, %329 : vector<1x1x1xf32>
    %cst_133 = arith.constant 3.906250e-03 : f32
    %331 = vector.broadcast %cst_133 : f32 to vector<1x1x1xf32>
    %332 = arith.mulf %328, %331 : vector<1x1x1xf32>
    %333 = arith.mulf %330, %330 : vector<1x1x1xf32>
    %334 = arith.subf %332, %333 : vector<1x1x1xf32>
    %cst_134 = arith.constant 0.000000e+00 : f32
    %335 = vector.broadcast %cst_134 : f32 to vector<1x1x1xf32>
    %336 = arith.maximumf %334, %335 : vector<1x1x1xf32>
    %c0_135 = arith.constant 0 : index
    %c7_136 = arith.constant 7 : index
    %c0_137 = arith.constant 0 : index
    %337 = vector.load %arg2[%c0_135, %c7_136, %c0_137] : memref<2x8x1xf32, #tpu.memory_space<vmem>>, vector<1x1x1xf32>
    %338 = vector.shape_cast %337 : vector<1x1x1xf32> to vector<1x1xf32>
    %c1_138 = arith.constant 1 : index
    %c7_139 = arith.constant 7 : index
    %c0_140 = arith.constant 0 : index
    %339 = vector.load %arg2[%c1_138, %c7_139, %c0_140] : memref<2x8x1xf32, #tpu.memory_space<vmem>>, vector<1x1x1xf32>
    %340 = vector.shape_cast %339 : vector<1x1x1xf32> to vector<1x1xf32>
    %cst_141 = arith.constant 9.99999974E-6 : f32
    %341 = vector.broadcast %cst_141 : f32 to vector<1x1x1xf32>
    %342 = arith.addf %336, %341 : vector<1x1x1xf32>
    %343 = math.rsqrt %342 : vector<1x1x1xf32>
    %344 = vector.shape_cast %338 : vector<1x1xf32> to vector<1x1x1xf32>
    %345 = arith.mulf %344, %343 : vector<1x1x1xf32>
    %346 = arith.mulf %330, %345 : vector<1x1x1xf32>
    %347 = vector.shape_cast %340 : vector<1x1xf32> to vector<1x1x1xf32>
    %348 = arith.subf %347, %346 : vector<1x1x1xf32>
    %349 = vector.broadcast %345 : vector<1x1x1xf32> to vector<2x1x128xf32>
    %350 = arith.mulf %319, %349 : vector<2x1x128xf32>
    %351 = vector.broadcast %348 : vector<1x1x1xf32> to vector<2x1x128xf32>
    %352 = arith.addf %350, %351 : vector<2x1x128xf32>
    %cst_142 = arith.constant 0.000000e+00 : f32
    %353 = vector.broadcast %cst_142 : f32 to vector<2x1x128xf32>
    %354 = arith.maximumf %352, %353 : vector<2x1x128xf32>
    %c0_143 = arith.constant 0 : index
    %c7_144 = arith.constant 7 : index
    %c0_145 = arith.constant 0 : index
    %355 = vector.load %arg3[%c0_143, %c7_144, %c0_145] : memref<2x8x128xf32, #tpu.memory_space<vmem>>, vector<2x1x128xf32>
    tpu.vector_store %arg3[%c0_143, %c7_144, %c0_145], %354 {strides = array<i32>} : memref<2x8x128xf32, #tpu.memory_space<vmem>>, vector<2x1x128xf32>,
    return
  }
}

</mosaic_0001>

<bundles_post_ra>
// kernel: tpu_custom_call.1
= control target key start
LH: loop header
LB: loop body
LE: loop exit
PB: predicated region body
PF: predicated region fallthrough
CT: control target
= control target key end

     0   :  { %8 = vsyncpa [#allocation3], 0  ;;  %s782_s0 = inlined_call_operand.vmem [shape: f32[2,8,128], index: 0, kind: input, shape index: {}]   ;;  %s783_s1 = inlined_call_operand.hbm [shape: f32[24,8,128], index: 1, kind: input, shape index: {}]   ;;  %s784_s2 = inlined_call_operand.vmem [shape: f32[2,8,1], index: 2, kind: input, shape index: {}]   ;;  %s785_s3 = inlined_call_operand.hbm [shape: f32[2,8,128], index: 3, kind: output, shape index: {}]  }
   0x1   :  { %9 = vsyncpa [#allocation4], 0  ;;  %s620_s12 = smov [#allocation2]   ;;  %s572_s16 = scalar_lea.hbm %s783_s1, 3072 }
   0x2   :  { %s17_s13 = sshll.u32 %s620_s12, 4  ;;  %p573_p0 = scmp.ne.s32.totalorder %s783_s1, %s572_s16  ;;  %s18_s13 = int_to_ptr.vmem [resolvable:$true] %s17_s13 }
   0x3   :  { %p576_p1 = scmp.lt.u32.totalorder %s572_s16, %s783_s1 }
   0x5   :  { %p578_p2 = pnand %p576_p1, %p573_p0 }
   0x7   :  { %581 = shalt.err (!%p578_p2)
}
   0x8   :  { %s582_s21 = scalar_lea.vmem %s18_s13, 3072  ;;  %p587_p4 = scmp.lt.s32.totalorder %s18_s13, %s18_s13 }
   0x9   :  { %p583_p3 = scmp.ne.s32.totalorder %s18_s13, %s582_s21  ;;  %p588_p5 = scmp.lt.s32.totalorder %s582_s21, %s582_s21 }
   0xb   :  { %p589_p6 = por %p588_p5, %p587_p4 }
   0xd   :  { %p590_p7 = pnand %p589_p6, %p583_p3 }
   0xf   :  { %593 = shalt.err (!%p590_p7)
}
  0x10   :  { %s621_s22 = smov 128   ;;  %s622_s23 = smov 8  }
  0x11   :  { %23 = dma.hbm_to_vmem [thread:$0]  %s783_s1, 3072, %s18_s13, [#allocation3], %s621_s22, %s621_s22, %s622_s23  }
  0x12   :  { %616 = dma.done.wait [#allocation3], 3072  }
  0x13   :  { %617 = vsyncadd [#allocation3], 4294964224  ;;  %v29_v0 = vld [vmem:[%s782_s0] sm:$0xff]  ;;  %s623_s28 = smov 1   ;;  %s624_s29 = smov 127   ;;  %v30_v1 = vld [vmem:[%s782_s0 + $0x8] sm:$0xff]  ;;  %v31_v2 = vlaneseq }
  0x14   :  { %34 = vrot.lane.b32.xlu0 %v29_v0, %s623_s28  ;;  %43 = vrot.lane.b32.xlu1 %v29_v0, %s624_s29  ;;  %v55_v4 = vld [vmem:[#allocation2 + $0x8] sm:$0xff]  ;;  %v83_v5 = vld [vmem:[#allocation2 + $0x20] sm:$0xff]  ;;  %v111_v6 = vld [vmem:[#allocation2 + $0x38] sm:$0xff]  ;;  %vm162_vm2 = vcmask 1040384   ;;  %vm165_vm3 = vcmask 1041408   ;;  %vm168_vm4 = vcmask 1042432  }
  0x15   :  { %v673_v3 = vand.u32 127, %v31_v2  ;;  %v139_v7 = vld [vmem:[#allocation2 + $0x50] sm:$0xff]  ;;  %v51_v8 = vld [vmem:[#allocation2] sm:$0xff]  ;;  %v79_v9 = vld [vmem:[#allocation2 + $0x18] sm:$0xff]  ;;  %v56_v14 = vmul.f32 %v55_v4, %v29_v0  ;;  %v84_v15 = vmul.f32 %v83_v5, %v29_v0  ;;  %v112_v16 = vmul.f32 %v111_v6, %v29_v0  ;;  %s626_s7 = smov 2   ;;  %s627_s8 = smov 126  }
  0x16   :  { %v107_v10 = vld [vmem:[#allocation2 + $0x30] sm:$0xff]  ;;  %v135_v11 = vld [vmem:[#allocation2 + $0x48] sm:$0xff]  ;;  %v140_v17 = vmul.f32 %v139_v7, %v29_v0  ;;  %v117_v19 = vld [vmem:[#allocation2 + $0x40] sm:$0xff]  ;;  %v57_v24 = vmul.f32 %v55_v4, %v30_v1  ;;  %v85_v25 = vmul.f32 %v83_v5, %v30_v1  ;;  %v113_v40 = vmul.f32 %v111_v6, %v30_v1  ;;  %s628_s13 = smov 124   ;;  %s629_s14 = smov 4  }
  0x17   :  { %vm33_vm0 = vcmp.ge.s32.totalorder %v673_v3, 1  ;;  %vm42_vm1 = vcmp.lt.s32.totalorder %v673_v3, 127  ;;  %v61_v12 = vld [vmem:[#allocation2 + $0x10] sm:$0xff]  ;;  %v89_v18 = vld [vmem:[#allocation2 + $0x28] sm:$0xff]  ;;  %v145_v20 = vld [vmem:[#allocation2 + $0x58] sm:$0xff]  ;;  %v141_v41 = vmul.f32 %v139_v7, %v30_v1  ;;  %vm171_vm5 = vcmask 1043456  }
  0x18   :  { %36 = vrot.lane.b32.xlu0 %v30_v1, %s623_s28  ;;  %45 = vrot.lane.b32.xlu1 %v30_v1, %s624_s29  ;;  %vm223_vm6 = vcmp.ge.s32.totalorder %v673_v3, 2  ;;  %vm232_vm7 = vcmp.lt.s32.totalorder %v673_v3, 126  ;;  %vm362_vm8 = vcmp.lt.s32.totalorder %v673_v3, 124  ;;  %vm353_vm9 = vcmp.ge.s32.totalorder %v673_v3, 4  ;;  %s630_s19 = smov 120   ;;  %s631_s26 = smov [#allocation5]  }
  0x19   :  { %vm452_vm10 = vcmp.lt.s32.totalorder %v673_v3, 120  ;;  %vm443_vm11 = vcmp.ge.s32.totalorder %v673_v3, 8  ;;  %s534_s27 = sshll.u32 %s631_s26, 4  ;;  %s535_s27 = int_to_ptr.vmem [resolvable:$true] %s534_s27 }
  0x1a   :  { %s594_s28 = scalar_lea.vmem %s535_s27, 256  ;;  %p599_p9 = scmp.lt.s32.totalorder %s535_s27, %s535_s27 }
  0x1b   :  { %p595_p8 = scmp.ne.s32.totalorder %s535_s27, %s594_s28  ;;  %p600_p10 = scmp.lt.s32.totalorder %s594_s28, %s594_s28 }
  0x1d   :  { %p601_p11 = por %p600_p10, %p599_p9 }
  0x1f   :  { %p602_p12 = pnand %p601_p11, %p595_p8 }
  0x86   :  { %v35_v13 = vpop.permute.xlu0 %34  ;;  %v44_v21 = vpop.permute.xlu1 %43 }
  0x87   :  { %v40_v22 = vsel %vm33_vm0, %v35_v13, 0.0  ;;  %v49_v23 = vsel %vm42_vm1, %v44_v21, 0.0 }
  0x88   :  { %v52_v26 = vmul.f32 %v51_v8, %v40_v22  ;;  %v80_v27 = vmul.f32 %v79_v9, %v40_v22  ;;  %v108_v28 = vmul.f32 %v107_v10, %v40_v22  ;;  %v136_v29 = vmul.f32 %v135_v11, %v40_v22 }
  0x89   :  { %v62_v30 = vmul.f32 %v61_v12, %v49_v23  ;;  %v90_v31 = vmul.f32 %v89_v18, %v49_v23  ;;  %v118_v32 = vmul.f32 %v117_v19, %v49_v23  ;;  %v146_v33 = vmul.f32 %v145_v20, %v49_v23 }
  0x8a   :  { %v58_v34 = vadd.f32 %v56_v14, %v52_v26  ;;  %v86_v35 = vadd.f32 %v84_v15, %v80_v27  ;;  %v114_v36 = vadd.f32 %v112_v16, %v108_v28  ;;  %v142_v37 = vadd.f32 %v140_v17, %v136_v29  ;;  %v37_v38 = vpop.permute.xlu0 %36  ;;  %v46_v39 = vpop.permute.xlu1 %45 }
  0x8b   :  { %v41_v42 = vsel %vm33_vm0, %v37_v38, 0.0  ;;  %v50_v43 = vsel %vm42_vm1, %v46_v39, 0.0 }
  0x8c   :  { %v64_v44 = vadd.f32 %v62_v30, %v58_v34  ;;  %v92_v45 = vadd.f32 %v90_v31, %v86_v35  ;;  %v120_v46 = vadd.f32 %v118_v32, %v114_v36  ;;  %v148_v47 = vadd.f32 %v146_v33, %v142_v37 }
  0x8d   :  { %v53_v48 = vmul.f32 %v51_v8, %v41_v42  ;;  %v81_v49 = vmul.f32 %v79_v9, %v41_v42  ;;  %v109_v50 = vmul.f32 %v107_v10, %v41_v42  ;;  %v137_v51 = vmul.f32 %v135_v11, %v41_v42 }
  0x8e   :  { %v66_v52 = vrot.slane %v64_v44, 4  ;;  %v94_v53 = vrot.slane %v92_v45, 4  ;;  %v122_v54 = vrot.slane %v120_v46, 4  ;;  %v150_v55 = vrot.slane %v148_v47, 4 }
  0x8f   :  { %v59_v56 = vadd.f32 %v57_v24, %v53_v48  ;;  %v87_v57 = vadd.f32 %v85_v25, %v81_v49  ;;  %v115_v58 = vadd.f32 %v113_v40, %v109_v50  ;;  %v143_v59 = vadd.f32 %v141_v41, %v137_v51 }
  0x90   :  { %v67_v60 = vadd.f32 %v66_v52, %v64_v44  ;;  %v95_v61 = vadd.f32 %v94_v53, %v92_v45  ;;  %v123_v62 = vadd.f32 %v122_v54, %v120_v46  ;;  %v151_v63 = vadd.f32 %v150_v55, %v148_v47 }
  0x91   :  { %v63_v0 = vmul.f32 %v61_v12, %v50_v43  ;;  %v91_v1 = vmul.f32 %v89_v18, %v50_v43  ;;  %v119_v2 = vmul.f32 %v117_v19, %v50_v43  ;;  %v147_v4 = vmul.f32 %v145_v20, %v50_v43 }
  0x92   :  { %v68_v5 = vrot.slane %v67_v60, 2  ;;  %v96_v6 = vrot.slane %v95_v61, 2  ;;  %v124_v7 = vrot.slane %v123_v62, 2  ;;  %v152_v8 = vrot.slane %v151_v63, 2 }
  0x93   :  { %v65_v9 = vadd.f32 %v63_v0, %v59_v56  ;;  %v93_v10 = vadd.f32 %v91_v1, %v87_v57  ;;  %v121_v11 = vadd.f32 %v119_v2, %v115_v58  ;;  %v149_v13 = vadd.f32 %v147_v4, %v143_v59 }
  0x94   :  { %v69_v14 = vadd.f32 %v68_v5, %v67_v60  ;;  %v97_v15 = vadd.f32 %v96_v6, %v95_v61  ;;  %v125_v16 = vadd.f32 %v124_v7, %v123_v62  ;;  %v153_v17 = vadd.f32 %v152_v8, %v151_v63 }
  0x95   :  { %v72_v21 = vrot.slane %v65_v9, 4  ;;  %v100_v22 = vrot.slane %v93_v10, 4  ;;  %v128_v23 = vrot.slane %v121_v11, 4  ;;  %v156_v24 = vrot.slane %v149_v13, 4 }
  0x96   :  { %v70_v12 = vrot.slane %v69_v14, 1  ;;  %v98_v18 = vrot.slane %v97_v15, 1  ;;  %v126_v19 = vrot.slane %v125_v16, 1  ;;  %v154_v20 = vrot.slane %v153_v17, 1 }
  0x97   :  { %v73_v25 = vadd.f32 %v72_v21, %v65_v9  ;;  %v101_v26 = vadd.f32 %v100_v22, %v93_v10  ;;  %v129_v27 = vadd.f32 %v128_v23, %v121_v11  ;;  %v157_v28 = vadd.f32 %v156_v24, %v149_v13  ;;  %v546_v22 = vld [vmem:[%s784_s2 + $0x8] sm:$0xf] }
  0x98   :  { %v71_v29 = vadd.f32 %v70_v12, %v69_v14  ;;  %v99_v30 = vadd.f32 %v98_v18, %v97_v15  ;;  %v127_v31 = vadd.f32 %v126_v19, %v125_v16  ;;  %v155_v36 = vadd.f32 %v154_v20, %v153_v17  ;;  %v197_v16 = vld [vmem:[%s784_s2] sm:$0xf] }
  0x99   :  { %v74_v32 = vrot.slane %v73_v25, 2  ;;  %v102_v33 = vrot.slane %v101_v26, 2  ;;  %v130_v34 = vrot.slane %v129_v27, 2  ;;  %v158_v35 = vrot.slane %v157_v28, 2 }
  0x9a   :  { %v163_v37 = vsel %vm162_vm2, %v71_v29, %v99_v30  ;;  %v625_v61 = vmov 0   ;;  %v242_v30 = vld [vmem:[#allocation2 + $0x60] sm:$0xf] }
  0x9b   :  { %v75_v38 = vadd.f32 %v74_v32, %v73_v25  ;;  %v103_v39 = vadd.f32 %v102_v33, %v101_v26  ;;  %v131_v40 = vadd.f32 %v130_v34, %v129_v27  ;;  %v166_v41 = vsel %vm165_vm3, %v163_v37, %v127_v31  ;;  %562 = vset.pattern.permute.xlu1 %v625_v61  ;;  %v272_v31 = vld [vmem:[#allocation2 + $0x78] sm:$0xf]  ;;  %v246_v34 = vld [vmem:[#allocation2 + $0x68] sm:$0xf] }
  0x9c   :  { %v169_v42 = vsel %vm168_vm4, %v166_v41, %v155_v36  ;;  %v159_v43 = vadd.f32 %v158_v35, %v157_v28  ;;  %563 = vset.pattern.permute.xlu0 %v625_v61  ;;  %v276_v35 = vld [vmem:[#allocation2 + $0x80] sm:$0xf] }
  0x9d   :  { %v76_v44 = vrot.slane %v75_v38, 1  ;;  %v104_v45 = vrot.slane %v103_v39, 1  ;;  %v172_v46 = vsel %vm171_vm5, %v169_v42, 0.0  ;;  %v132_v47 = vrot.slane %v131_v40, 1 }
  0x9e   :  { %173 = vadd.xlane.f32.xlu0 %v172_v46  ;;  %v160_v48 = vrot.slane %v159_v43, 1  ;;  %v181_v49 = vmul.f32 %v169_v42, %v169_v42 }
  0x9f   :  { %v77_v50 = vadd.f32 %v76_v44, %v75_v38  ;;  %v105_v51 = vadd.f32 %v104_v45, %v103_v39  ;;  %v133_v52 = vadd.f32 %v132_v47, %v131_v40  ;;  %v252_v39 = vld [vmem:[#allocation2 + $0x70] sm:$0xf]  ;;  %v282_v40 = vld [vmem:[#allocation2 + $0x88] sm:$0xf] }
  0xa0   :  { %v161_v53 = vadd.f32 %v160_v48, %v159_v43  ;;  %v183_v55 = vsel %vm171_vm5, %v181_v49, 0.0 }
  0xa1   :  { %v164_v54 = vsel %vm162_vm2, %v77_v50, %v105_v51 }
  0xa2   :  { %v167_v56 = vsel %vm165_vm3, %v164_v54, %v133_v52  ;;  %184 = vadd.xlane.f32.xlu0 %v183_v55 }
  0xa3   :  { %v170_v57 = vsel %vm168_vm4, %v167_v56, %v161_v53 }
  0xa4   :  { %v175_v58 = vsel %vm171_vm5, %v170_v57, 0.0  ;;  %v182_v59 = vmul.f32 %v170_v57, %v170_v57 }
  0xa5   :  { %176 = vadd.xlane.f32.xlu1 %v175_v58 }
  0xa6   :  { %v186_v60 = vsel %vm171_vm5, %v182_v59, 0.0 }
  0xa7   :  { %187 = vadd.xlane.f32.xlu0 %v186_v60 }
 0x12b   :  { %v174_v62 = vpop.xlane.xlu0 %173 }
 0x12c   :  { %v178_v1 = vsel %vm171_vm5, %v174_v62, 0.0 }
 0x12f   :  { %v185_v63 = vpop.xlane.xlu0 %184 }
 0x130   :  { %v189_v6 = vsel %vm171_vm5, %v185_v63, 0.0 }
 0x132   :  { %v177_v0 = vpop.xlane.xlu1 %176 }
 0x133   :  { %v179_v2 = vsel %vm171_vm5, %v177_v0, 0.0 }
 0x134   :  { %v180_v4 = vadd.f32 %v179_v2, %v178_v1  ;;  %v188_v5 = vpop.xlane.xlu0 %187 }
 0x135   :  { %v190_v7 = vsel %vm171_vm5, %v188_v5, 0.0 }
 0x136   :  { %v192_v8 = vmul.f32 0.00390625, %v180_v4  ;;  %v191_v9 = vadd.f32 %v190_v7, %v189_v6 }
 0x138   :  { %v194_v10 = vmul.f32 %v192_v8, %v192_v8  ;;  %v193_v11 = vmul.f32 0.00390625, %v191_v9 }
 0x13a   :  { %v195_v13 = vsub.f32 %v193_v11, %v194_v10 }
 0x13c   :  { %v196_v14 = vmax.f32 %v195_v13, 0.0 }
 0x13e   :  { %v200_v15 = vadd.f32 1e-05, %v196_v14 }
 0x140   :  { %564 = vrsqrt.f32 %v200_v15 }
 0x14a   :  { %v565_v17 = vpop.eup %564 }
 0x14b   :  { %v202_v21 = vmul.f32 %v565_v17, %v197_v16 }
 0x14d   :  { %207 = vperm.xlu1 %562, %v202_v21   ;;  %v203_v23 = vmul.f32 %v202_v21, %v192_v8 }
 0x14f   :  { %v204_v24 = vsub.f32 %v546_v22, %v203_v23 }
 0x151   :  { %214 = vperm.xlu0 %563, %v204_v24  }
 0x1cc   :  { %v208_v12 = vpop.permute.xlu1 %207 }
 0x1cd   :  { %v210_v18 = vmul.f32 %v208_v12, %v169_v42  ;;  %v211_v19 = vmul.f32 %v208_v12, %v170_v57 }
 0x1d0   :  { %v215_v20 = vpop.permute.xlu0 %214 }
 0x1d1   :  { %v217_v25 = vadd.f32 %v215_v20, %v210_v18  ;;  %v218_v26 = vadd.f32 %v215_v20, %v211_v19 }
 0x1d3   :  { %v219_v27 = vmax.f32 %v217_v25, 0.0  ;;  %v220_v28 = vmax.f32 %v218_v26, 0.0 }
 0x1d5   :  { %221 = vst [vmem:[#allocation5] sm:$0xf] %v219_v27  ;;  %222 = vst [vmem:[#allocation5 + $0x8] sm:$0xf] %v220_v28  ;;  %224 = vrot.lane.b32.xlu1 %v219_v27, %s626_s7  ;;  %v247_v41 = vmul.f32 %v246_v34, %v219_v27  ;;  %v277_v42 = vmul.f32 %v276_v35, %v219_v27  ;;  %v248_v51 = vmul.f32 %v246_v34, %v220_v28 }
 0x1d6   :  { %v278_v52 = vmul.f32 %v276_v35, %v220_v28 }
 0x1d9   :  { %226 = vrot.lane.b32.xlu1 %v220_v28, %s626_s7 }
 0x1dd   :  { %233 = vrot.lane.b32.xlu1 %v219_v27, %s627_s8 }
 0x1e1   :  { %235 = vrot.lane.b32.xlu1 %v220_v28, %s627_s8 }
 0x247   :  { %v225_v29 = vpop.permute.xlu1 %224 }
 0x248   :  { %v230_v32 = vsel %vm223_vm6, %v225_v29, 0.0 }
 0x249   :  { %v243_v36 = vmul.f32 %v242_v30, %v230_v32  ;;  %v273_v37 = vmul.f32 %v272_v31, %v230_v32 }
 0x24b   :  { %v227_v33 = vpop.permute.xlu1 %226  ;;  %v249_v47 = vadd.f32 %v247_v41, %v243_v36  ;;  %v279_v48 = vadd.f32 %v277_v42, %v273_v37 }
 0x24c   :  { %v231_v38 = vsel %vm223_vm6, %v227_v33, 0.0 }
 0x24d   :  { %v244_v44 = vmul.f32 %v242_v30, %v231_v38  ;;  %v274_v45 = vmul.f32 %v272_v31, %v231_v38 }
 0x24f   :  { %v234_v43 = vpop.permute.xlu1 %233  ;;  %v250_v56 = vadd.f32 %v248_v51, %v244_v44  ;;  %v280_v57 = vadd.f32 %v278_v52, %v274_v45  ;;  %v328_v52 = vld [vmem:[%s784_s2 + $0x4] sm:$0x3] }
 0x250   :  { %v239_v46 = vsel %vm232_vm7, %v234_v43, 0.0 }
 0x251   :  { %v253_v49 = vmul.f32 %v252_v39, %v239_v46  ;;  %v283_v50 = vmul.f32 %v282_v40, %v239_v46 }
 0x253   :  { %v255_v53 = vadd.f32 %v253_v49, %v249_v47  ;;  %v285_v54 = vadd.f32 %v283_v50, %v279_v48  ;;  %v236_v55 = vpop.permute.xlu1 %235 }
 0x254   :  { %v240_v58 = vsel %vm232_vm7, %v236_v55, 0.0  ;;  %v547_v55 = vld [vmem:[%s784_s2 + $0xc] sm:$0x3] }
 0x255   :  { %v257_v59 = vsel %vm171_vm5, %v255_v53, 0.0  ;;  %v287_v60 = vsel %vm171_vm5, %v285_v54, 0.0  ;;  %v254_v61 = vmul.f32 %v252_v39, %v240_v58  ;;  %v284_v62 = vmul.f32 %v282_v40, %v240_v58 }
 0x256   :  { %v258_v63 = vrot.slane %v257_v59, 4  ;;  %v288_v0 = vrot.slane %v287_v60, 4 }
 0x257   :  { %v256_v1 = vadd.f32 %v254_v61, %v250_v56  ;;  %v286_v2 = vadd.f32 %v284_v62, %v280_v57 }
 0x258   :  { %v259_v4 = vadd.f32 %v258_v63, %v257_v59  ;;  %v289_v5 = vadd.f32 %v288_v0, %v287_v60 }
 0x259   :  { %v264_v6 = vsel %vm171_vm5, %v256_v1, 0.0  ;;  %v294_v7 = vsel %vm171_vm5, %v286_v2, 0.0  ;;  %v372_v2 = vld [vmem:[#allocation2 + $0x90] sm:$0x3] }
 0x25a   :  { %v260_v8 = vrot.slane %v259_v4, 2  ;;  %v290_v9 = vrot.slane %v289_v5, 2  ;;  %v265_v10 = vrot.slane %v264_v6, 4  ;;  %v295_v11 = vrot.slane %v294_v7, 4 }
 0x25c   :  { %v261_v13 = vadd.f32 %v260_v8, %v259_v4  ;;  %v291_v14 = vadd.f32 %v290_v9, %v289_v5  ;;  %v266_v15 = vadd.f32 %v265_v10, %v264_v6  ;;  %v296_v16 = vadd.f32 %v295_v11, %v294_v7  ;;  %v376_v4 = vld [vmem:[#allocation2 + $0x98] sm:$0x3]  ;;  %v382_v7 = vld [vmem:[#allocation2 + $0xa0] sm:$0x3] }
 0x25e   :  { %v267_v17 = vrot.slane %v266_v15, 2  ;;  %v297_v21 = vrot.slane %v296_v16, 2  ;;  %v262_v22 = vrot.slane %v261_v13, 1  ;;  %v292_v23 = vrot.slane %v291_v14, 1 }
 0x260   :  { %v268_v24 = vadd.f32 %v267_v17, %v266_v15  ;;  %v298_v12 = vadd.f32 %v297_v21, %v296_v16  ;;  %v263_v18 = vadd.f32 %v262_v22, %v261_v13  ;;  %v293_v19 = vadd.f32 %v292_v23, %v291_v14 }
 0x262   :  { %v301_v20 = vsel %vm162_vm2, %v263_v18, %v293_v19  ;;  %v269_v25 = vrot.slane %v268_v24, 1  ;;  %v299_v26 = vrot.slane %v298_v12, 1 }
 0x263   :  { %v303_v27 = vsel %vm165_vm3, %v301_v20, 0.0  ;;  %v312_v28 = vmul.f32 %v301_v20, %v301_v20 }
 0x264   :  { %304 = vadd.xlane.f32.xlu1 %v303_v27  ;;  %v270_v29 = vadd.f32 %v269_v25, %v268_v24  ;;  %v300_v30 = vadd.f32 %v299_v26, %v298_v12 }
 0x265   :  { %v314_v33 = vsel %vm165_vm3, %v312_v28, 0.0 }
 0x266   :  { %v302_v31 = vsel %vm162_vm2, %v270_v29, %v300_v30 }
 0x267   :  { %v306_v32 = vsel %vm165_vm3, %v302_v31, 0.0  ;;  %v313_v34 = vmul.f32 %v302_v31, %v302_v31 }
 0x268   :  { %307 = vadd.xlane.f32.xlu0 %v306_v32  ;;  %315 = vadd.xlane.f32.xlu1 %v314_v33 }
 0x269   :  { %v317_v35 = vsel %vm165_vm3, %v313_v34, 0.0 }
 0x26c   :  { %318 = vadd.xlane.f32.xlu1 %v317_v35 }
 0x2f1   :  { %v305_v36 = vpop.xlane.xlu1 %304 }
 0x2f2   :  { %v309_v39 = vsel %vm165_vm3, %v305_v36, 0.0 }
 0x2f5   :  { %v308_v37 = vpop.xlane.xlu0 %307  ;;  %v316_v38 = vpop.xlane.xlu1 %315 }
 0x2f6   :  { %v310_v40 = vsel %vm165_vm3, %v308_v37, 0.0  ;;  %v320_v44 = vsel %vm165_vm3, %v316_v38, 0.0 }
 0x2f7   :  { %v311_v41 = vadd.f32 %v310_v40, %v309_v39 }
 0x2f9   :  { %v323_v42 = vmul.f32 0.00390625, %v311_v41  ;;  %v319_v43 = vpop.xlane.xlu1 %318 }
 0x2fa   :  { %v321_v45 = vsel %vm165_vm3, %v319_v43, 0.0 }
 0x2fb   :  { %v322_v46 = vadd.f32 %v321_v45, %v320_v44  ;;  %v325_v47 = vmul.f32 %v323_v42, %v323_v42 }
 0x2fd   :  { %v324_v48 = vmul.f32 0.00390625, %v322_v46 }
 0x2ff   :  { %v326_v49 = vsub.f32 %v324_v48, %v325_v47 }
 0x301   :  { %v327_v50 = vmax.f32 %v326_v49, 0.0 }
 0x303   :  { %v330_v51 = vadd.f32 1e-05, %v327_v50 }
 0x305   :  { %566 = vrsqrt.f32 %v330_v51 }
 0x30f   :  { %v567_v53 = vpop.eup %566 }
 0x310   :  { %v332_v54 = vmul.f32 %v567_v53, %v328_v52  ;;  %v418_v52 = vld [vmem:[%s784_s2 + $0x6] sm:$0x1] }
 0x312   :  { %337 = vperm.xlu1 %562, %v332_v54   ;;  %v333_v56 = vmul.f32 %v332_v54, %v323_v42 }
 0x314   :  { %v334_v57 = vsub.f32 %v547_v55, %v333_v56  ;;  %v548_v55 = vld [vmem:[%s784_s2 + $0xe] sm:$0x1] }
 0x316   :  { %344 = vperm.xlu0 %563, %v334_v57  }
 0x391   :  { %v338_v58 = vpop.permute.xlu1 %337 }
 0x392   :  { %v340_v59 = vmul.f32 %v338_v58, %v301_v20  ;;  %v341_v60 = vmul.f32 %v338_v58, %v302_v31 }
 0x395   :  { %v345_v61 = vpop.permute.xlu0 %344 }
 0x396   :  { %v347_v62 = vadd.f32 %v345_v61, %v340_v59  ;;  %v348_v63 = vadd.f32 %v345_v61, %v341_v60 }
 0x398   :  { %v349_v0 = vmax.f32 %v347_v62, 0.0  ;;  %v350_v1 = vmax.f32 %v348_v63, 0.0 }
 0x39a   :  { %351 = vst [vmem:[#allocation5 + $0x4] sm:$0x3] %v349_v0  ;;  %352 = vst [vmem:[#allocation5 + $0xc] sm:$0x3] %v350_v1  ;;  %363 = vrot.lane.b32.xlu0 %v349_v0, %s628_s13  ;;  %354 = vrot.lane.b32.xlu1 %v349_v0, %s629_s14  ;;  %v377_v11 = vmul.f32 %v376_v4, %v349_v0  ;;  %v378_v23 = vmul.f32 %v376_v4, %v350_v1  ;;  %v466_v4 = vld [vmem:[#allocation2 + $0xb0] sm:$0x1] }
 0x39e   :  { %356 = vrot.lane.b32.xlu1 %v350_v1, %s629_s14 }
 0x3a2   :  { %365 = vrot.lane.b32.xlu1 %v350_v1, %s628_s13 }
 0x40c   :  { %v364_v5 = vpop.permute.xlu0 %363  ;;  %v355_v6 = vpop.permute.xlu1 %354 }
 0x40d   :  { %v369_v8 = vsel %vm362_vm8, %v364_v5, 0.0  ;;  %v360_v9 = vsel %vm353_vm9, %v355_v6, 0.0 }
 0x40e   :  { %v373_v10 = vmul.f32 %v372_v2, %v360_v9  ;;  %v383_v13 = vmul.f32 %v382_v7, %v369_v8 }
 0x410   :  { %v379_v14 = vadd.f32 %v377_v11, %v373_v10  ;;  %v357_v15 = vpop.permute.xlu1 %356 }
 0x411   :  { %v361_v16 = vsel %vm353_vm9, %v357_v15, 0.0 }
 0x412   :  { %v385_v17 = vadd.f32 %v383_v13, %v379_v14  ;;  %v374_v21 = vmul.f32 %v372_v2, %v361_v16  ;;  %v462_v2 = vld [vmem:[#allocation2 + $0xa8] sm:$0x1] }
 0x414   :  { %v387_v22 = vsel %vm165_vm3, %v385_v17, 0.0  ;;  %v366_v24 = vpop.permute.xlu1 %365  ;;  %v380_v19 = vadd.f32 %v378_v23, %v374_v21 }
 0x415   :  { %v388_v12 = vrot.slane %v387_v22, 4  ;;  %v370_v18 = vsel %vm362_vm8, %v366_v24, 0.0 }
 0x416   :  { %v384_v20 = vmul.f32 %v382_v7, %v370_v18  ;;  %v472_v7 = vld [vmem:[#allocation2 + $0xb8] sm:$0x1] }
 0x417   :  { %v389_v25 = vadd.f32 %v388_v12, %v387_v22 }
 0x418   :  { %v386_v26 = vadd.f32 %v384_v20, %v380_v19 }
 0x419   :  { %v390_v27 = vrot.slane %v389_v25, 2 }
 0x41a   :  { %v394_v28 = vsel %vm165_vm3, %v386_v26, 0.0 }
 0x41b   :  { %v395_v29 = vrot.slane %v394_v28, 4  ;;  %v391_v30 = vadd.f32 %v390_v27, %v389_v25 }
 0x41d   :  { %v396_v31 = vadd.f32 %v395_v29, %v394_v28  ;;  %v392_v32 = vrot.slane %v391_v30, 1 }
 0x41f   :  { %v393_v33 = vadd.f32 %v392_v32, %v391_v30  ;;  %v397_v34 = vrot.slane %v396_v31, 2 }
 0x421   :  { %401 = vadd.xlane.f32.xlu0 %v393_v33  ;;  %v398_v35 = vadd.f32 %v397_v34, %v396_v31  ;;  %v406_v36 = vmul.f32 %v393_v33, %v393_v33 }
 0x423   :  { %v399_v37 = vrot.slane %v398_v35, 1 }
 0x425   :  { %408 = vadd.xlane.f32.xlu0 %v406_v36  ;;  %v400_v38 = vadd.f32 %v399_v37, %v398_v35 }
 0x427   :  { %403 = vadd.xlane.f32.xlu1 %v400_v38  ;;  %v407_v39 = vmul.f32 %v400_v38, %v400_v38 }
 0x429   :  { %410 = vadd.xlane.f32.xlu0 %v407_v39 }
 0x4ae   :  { %v402_v40 = vpop.xlane.xlu0 %401 }
 0x4b2   :  { %v409_v41 = vpop.xlane.xlu0 %408 }
 0x4b4   :  { %v404_v42 = vpop.xlane.xlu1 %403 }
 0x4b5   :  { %v405_v43 = vadd.f32 %v404_v42, %v402_v40 }
 0x4b6   :  { %v411_v44 = vpop.xlane.xlu0 %410 }
 0x4b7   :  { %v413_v45 = vmul.f32 0.00390625, %v405_v43  ;;  %v412_v46 = vadd.f32 %v411_v44, %v409_v41 }
 0x4b9   :  { %v415_v47 = vmul.f32 %v413_v45, %v413_v45  ;;  %v414_v48 = vmul.f32 0.00390625, %v412_v46 }
 0x4bb   :  { %v416_v49 = vsub.f32 %v414_v48, %v415_v47  ;;  %v549_v48 = vld [vmem:[%s784_s2 + $0xf] sm:$0x1] }
 0x4bd   :  { %v417_v50 = vmax.f32 %v416_v49, 0.0 }
 0x4bf   :  { %v420_v51 = vadd.f32 1e-05, %v417_v50 }
 0x4c1   :  { %568 = vrsqrt.f32 %v420_v51 }
 0x4cb   :  { %v569_v53 = vpop.eup %568 }
 0x4cc   :  { %v422_v54 = vmul.f32 %v569_v53, %v418_v52 }
 0x4ce   :  { %427 = vperm.xlu1 %562, %v422_v54   ;;  %v423_v56 = vmul.f32 %v422_v54, %v413_v45  ;;  %v504_v45 = vld [vmem:[%s784_s2 + $0x7] sm:$0x1] }
 0x4d0   :  { %v424_v57 = vsub.f32 %v548_v55, %v423_v56 }
 0x4d2   :  { %434 = vperm.xlu0 %563, %v424_v57  }
 0x54d   :  { %v428_v58 = vpop.permute.xlu1 %427 }
 0x54e   :  { %v430_v59 = vmul.f32 %v428_v58, %v393_v33  ;;  %v431_v60 = vmul.f32 %v428_v58, %v400_v38 }
 0x551   :  { %v435_v61 = vpop.permute.xlu0 %434 }
 0x552   :  { %v437_v62 = vadd.f32 %v435_v61, %v430_v59  ;;  %v438_v63 = vadd.f32 %v435_v61, %v431_v60 }
 0x554   :  { %v439_v0 = vmax.f32 %v437_v62, 0.0  ;;  %v440_v1 = vmax.f32 %v438_v63, 0.0 }
 0x556   :  { %441 = vst [vmem:[#allocation5 + $0x6] sm:$0x1] %v439_v0  ;;  %442 = vst [vmem:[#allocation5 + $0xe] sm:$0x1] %v440_v1  ;;  %453 = vrot.lane.b32.xlu0 %v439_v0, %s630_s19  ;;  %444 = vrot.lane.b32.xlu1 %v439_v0, %s622_s23  ;;  %v467_v11 = vmul.f32 %v466_v4, %v439_v0  ;;  %v468_v22 = vmul.f32 %v466_v4, %v440_v1 }
 0x55a   :  { %446 = vrot.lane.b32.xlu1 %v440_v1, %s622_s23 }
 0x55e   :  { %455 = vrot.lane.b32.xlu1 %v440_v1, %s630_s19 }
 0x5c8   :  { %v454_v5 = vpop.permute.xlu0 %453  ;;  %v445_v6 = vpop.permute.xlu1 %444 }
 0x5c9   :  { %v459_v8 = vsel %vm452_vm10, %v454_v5, 0.0  ;;  %v450_v9 = vsel %vm443_vm11, %v445_v6, 0.0 }
 0x5ca   :  { %v463_v10 = vmul.f32 %v462_v2, %v450_v9  ;;  %v473_v13 = vmul.f32 %v472_v7, %v459_v8 }
 0x5cc   :  { %v469_v14 = vadd.f32 %v467_v11, %v463_v10  ;;  %v447_v15 = vpop.permute.xlu1 %446 }
 0x5cd   :  { %v451_v16 = vsel %vm443_vm11, %v447_v15, 0.0 }
 0x5ce   :  { %v464_v17 = vmul.f32 %v462_v2, %v451_v16  ;;  %v475_v21 = vadd.f32 %v473_v13, %v469_v14 }
 0x5d0   :  { %v456_v23 = vpop.permute.xlu1 %455  ;;  %v479_v24 = vsel %vm162_vm2, %v475_v21, 0.0  ;;  %v488_v12 = vmul.f32 %v475_v21, %v475_v21  ;;  %v470_v19 = vadd.f32 %v468_v22, %v464_v17 }
 0x5d1   :  { %v460_v18 = vsel %vm452_vm10, %v456_v23, 0.0  ;;  %480 = vadd.xlane.f32.xlu0 %v479_v24 }
 0x5d2   :  { %v474_v20 = vmul.f32 %v472_v7, %v460_v18  ;;  %v490_v26 = vsel %vm162_vm2, %v488_v12, 0.0 }
 0x5d4   :  { %v476_v25 = vadd.f32 %v474_v20, %v470_v19 }
 0x5d5   :  { %491 = vadd.xlane.f32.xlu0 %v490_v26 }
 0x5d6   :  { %v482_v27 = vsel %vm162_vm2, %v476_v25, 0.0  ;;  %v489_v28 = vmul.f32 %v476_v25, %v476_v25 }
 0x5d7   :  { %483 = vadd.xlane.f32.xlu1 %v482_v27 }
 0x5d8   :  { %v493_v29 = vsel %vm162_vm2, %v489_v28, 0.0 }
 0x5d9   :  { %494 = vadd.xlane.f32.xlu0 %v493_v29 }
 0x65e   :  { %v481_v30 = vpop.xlane.xlu0 %480 }
 0x65f   :  { %v485_v3 = vsel %vm162_vm2, %v481_v30, 0.0 }
 0x662   :  { %v492_v31 = vpop.xlane.xlu0 %491 }
 0x663   :  { %v496_v36 = vsel %vm162_vm2, %v492_v31, 0.0 }
 0x664   :  { %v484_v32 = vpop.xlane.xlu1 %483 }
 0x665   :  { %v486_v33 = vsel %vm162_vm2, %v484_v32, 0.0 }
 0x666   :  { %v487_v34 = vadd.f32 %v486_v33, %v485_v3  ;;  %v495_v35 = vpop.xlane.xlu0 %494 }
 0x667   :  { %v497_v37 = vsel %vm162_vm2, %v495_v35, 0.0 }
 0x668   :  { %v499_v38 = vmul.f32 0.00390625, %v487_v34  ;;  %v498_v39 = vadd.f32 %v497_v37, %v496_v36 }
 0x66a   :  { %v501_v40 = vmul.f32 %v499_v38, %v499_v38  ;;  %v500_v41 = vmul.f32 0.00390625, %v498_v39 }
 0x66c   :  { %v502_v42 = vsub.f32 %v500_v41, %v501_v40 }
 0x66e   :  { %v503_v43 = vmax.f32 %v502_v42, 0.0 }
 0x670   :  { %v506_v44 = vadd.f32 1e-05, %v503_v43 }
 0x672   :  { %570 = vrsqrt.f32 %v506_v44 }
 0x67c   :  { %v571_v46 = vpop.eup %570 }
 0x67d   :  { %v508_v47 = vmul.f32 %v571_v46, %v504_v45 }
 0x67f   :  { %513 = vperm.xlu1 %562, %v508_v47   ;;  %v509_v49 = vmul.f32 %v508_v47, %v499_v38 }
 0x681   :  { %v510_v50 = vsub.f32 %v549_v48, %v509_v49 }
 0x683   :  { %520 = vperm.xlu0 %563, %v510_v50  }
 0x6fe   :  { %v514_v51 = vpop.permute.xlu1 %513 }
 0x6ff   :  { %v516_v52 = vmul.f32 %v514_v51, %v475_v21  ;;  %v517_v53 = vmul.f32 %v514_v51, %v476_v25 }
 0x702   :  { %v521_v54 = vpop.permute.xlu0 %520 }
 0x703   :  { %v523_v55 = vadd.f32 %v521_v54, %v516_v52  ;;  %v524_v56 = vadd.f32 %v521_v54, %v517_v53 }
 0x705   :  { %v525_v57 = vmax.f32 %v523_v55, 0.0  ;;  %v526_v58 = vmax.f32 %v524_v56, 0.0 }
 0x707   :  { %527 = vst [vmem:[#allocation5 + $0x7] sm:$0x1] %v525_v57  ;;  %528 = vst [vmem:[#allocation5 + $0xf] sm:$0x1] %v526_v58 }
 0x708   :  { %605 = shalt.err (!%p602_p12)
}
 0x709   :  { %s606_s30 = scalar_lea.hbm %s785_s3, 256 }
 0x70a   :  { %p607_p13 = scmp.ne.s32.totalorder %s785_s3, %s606_s30  ;;  %p610_p0 = scmp.lt.u32.totalorder %s606_s30, %s785_s3 }
 0x70c   :  { %p612_p1 = pnand %p610_p0, %p607_p13 }
 0x70e   :  { %615 = shalt.err (!%p612_p1)
}
 0x70f   :  { %540 = dma.vmem_to_hbm [thread:$0]  %s535_s27, 256, %s785_s3, [#allocation4], %s621_s22, %s621_s22, %s622_s23  }
 0x710   :  { %618 = dma.done.wait [#allocation4], 256  }
 0x711   :  { %619 = vsyncadd [#allocation4], 4294967040 }
 0x712   :  { %544 = vsyncpa [#allocation3], 1 }
 0x713   :  { %545 = vsyncpa [#allocation4], 1 }

</bundles_post_ra>
